<compile_context>
chip_gen: v7x
topology: tpu7x:2x2x1
jax: 0.10.0
libtpu: 0.0.40
codegen_flags: <defaults>
</compile_context>

<pallas_src>
import jax
import jax.numpy as jnp
from jax.experimental import pallas as pl
from jax.experimental.pallas import tpu as pltpu


def _attention_kernel(q_ref, m_ref, wt_ref, w2p_ref, w3b_ref, out_ref):
    # q_ref   : [TB, Eq]          query tile
    # m_ref   : [TB, S*Em]        memory tile, lane-dense packed (S*Em == 128 here)
    # wt_ref  : [Eq, S*H]         W tiled S times along the hidden axis
    # w2p_ref : [S*Em, S*H]       block-diagonal W2
    # w3b_ref : [S*H, S]          block-diagonal W3
    # out_ref : [TB, S]           attention scores
    #
    # Both projections run on the MXU with f32 accumulation; the query broadcast
    # over the S memory slots is already folded into wt_ref, so the add below is
    # a plain lane-aligned VPU add on [TB, S*H] tiles.
    qw = jnp.dot(q_ref[...], wt_ref[...], preferred_element_type=jnp.float32)
    mw = jnp.dot(m_ref[...], w2p_ref[...], preferred_element_type=jnp.float32)

    # TODO(synk): attn_mask / addition_vec optional branches not implemented
    # (forward is exercised with None, None); only the base path is in-kernel.
    att = jnp.tanh(mw + qw)                              # [TB, S*H] f32, EUP

    # Per-slot sum over H expressed as a block-diagonal MXU matmul; avoids a
    # lane-crossing reshape + XLU segmented reduce. Output write volume is tiny
    # ([TB, 8] masked stores accepted per review).
    scores = jnp.dot(att, w3b_ref[...], preferred_element_type=jnp.float32)
    out_ref[...] = scores.astype(out_ref.dtype)


def _round_up(x, m):
    return (x + m - 1) // m * m


def _pick_batch_tile(B, block_b, align):
    """Largest multiple-of-`align` batch tile <= block_b; prefer >= 2 grid steps
    (keeps both v7x TensorCores issuing DMAs) whenever the padded batch allows."""
    bp = _round_up(B, align)
    tb = max(align, (min(block_b, bp) // align) * align)
    if tb >= bp and bp >= 2 * align:
        tb = _round_up(bp // 2, align)
    return tb


def attention_forward(query_embed, in_memory_embed, W, W2, W3,
                      *, block_b=1024, use_bf16=False):
    """Forward pass of AttentionModule. Returns [B*S, 1] like the PyTorch module."""
    B, Eq = query_embed.shape
    _, S, Em = in_memory_embed.shape
    H = W.shape[-1]

    # ---- Lane-dense repack (wrapper side; weights are tiny) -----------------
    # memory  [B, S, Em] -> [B, S*Em]     free contiguous reshape
    # W       [Eq, H]    -> [Eq, S*H]     tiled (folds the query broadcast)
    # W2      [Em, H]    -> [S*Em, S*H]   block-diagonal
    # W3      [H, 1]     -> [S*H, S]      block-diagonal
    mem_packed = in_memory_embed.reshape(B, S * Em)

    mm_dtype = query_embed.dtype
    if use_bf16 and mm_dtype != jnp.bfloat16:
        # NOTE: only a net win if the data already lives in bf16 upstream; a
        # wrapper-boundary f32->bf16 cast is an extra HBM pass.
        mm_dtype = jnp.bfloat16
        query_embed = query_embed.astype(mm_dtype)
        mem_packed = mem_packed.astype(mm_dtype)

    eye = jnp.eye(S, dtype=jnp.float32)
    w_tiled = jnp.tile(W, (1, S)).astype(mm_dtype)                       # [Eq, S*H]
    w2_packed = (eye[:, None, :, None] *
                 W2.astype(jnp.float32)[None, :, None, :]
                 ).reshape(S * Em, S * H).astype(mm_dtype)               # [S*Em, S*H]
    w3_blk = (eye[:, None, :] *
              W3.astype(jnp.float32).reshape(1, H, 1)
              ).reshape(S * H, S)                                        # [S*H, S], f32

    # ---- Batch tiling: pad B up to a tile multiple, slice output after ------
    align = 16 if mm_dtype == jnp.bfloat16 else 8   # bf16 min tile is (16, 128)
    tb = _pick_batch_tile(B, block_b, align)
    Bp = _round_up(B, tb)
    if Bp != B:
        query_embed = jnp.pad(query_embed, ((0, Bp - B), (0, 0)))
        mem_packed = jnp.pad(mem_packed, ((0, Bp - B), (0, 0)))
    grid = (Bp // tb,)

    out = pl.pallas_call(
        _attention_kernel,
        out_shape=jax.ShapeDtypeStruct((Bp, S), jnp.float32),
        grid=grid,
        in_specs=[
            pl.BlockSpec((tb, Eq), lambda i: (i, 0)),          # query tile
            pl.BlockSpec((tb, S * Em), lambda i: (i, 0)),      # packed memory tile
            pl.BlockSpec((Eq, S * H), lambda i: (0, 0)),       # W tiled   (resident)
            pl.BlockSpec((S * Em, S * H), lambda i: (0, 0)),   # W2 packed (resident)
            pl.BlockSpec((S * H, S), lambda i: (0, 0)),        # W3 packed (resident)
        ],
        out_specs=pl.BlockSpec((tb, S), lambda i: (i, 0)),
        compiler_params=pltpu.CompilerParams(
            dimension_semantics=("parallel",),
            vmem_limit_bytes=32 * 1024 * 1024),
    )(query_embed, mem_packed, w_tiled, w2_packed, w3_blk)

    # PyTorch returns att.view(att.size(0), -1) == [B*S, 1]; free wrapper reshape.
    return out[:B].reshape(B * S, 1)


def _xavier_uniform(key, shape):
    # PyTorch xavier_uniform_ on a 2D tensor: bound = sqrt(6 / (fan_in + fan_out)).
    bound = (6.0 / (shape[0] + shape[1])) ** 0.5
    return jax.random.uniform(key, shape, jnp.float32, -bound, bound)


def _reference(query_embed, in_memory_embed, W, W2, W3):
    B, S, Em = in_memory_embed.shape
    att = in_memory_embed.reshape(-1, Em).astype(jnp.float32) @ W2.astype(jnp.float32)
    att = att.reshape(B, S, -1)
    att = att + (query_embed.astype(jnp.float32) @ W.astype(jnp.float32))[:, None, :]
    att = jnp.tanh(att)
    att = att.reshape(-1, att.shape[-1]) @ W3
    return att.reshape(att.shape[0], -1)


if __name__ == "__main__":
    hidden_size = 32
    h_state_embed_size = 24
    in_memory_embed_size = 16
    S = 8

    key = jax.random.PRNGKey(0)
    kW, kW2, kW3, kq, km = jax.random.split(key, 5)

    W = _xavier_uniform(kW, (h_state_embed_size, hidden_size))
    W2 = _xavier_uniform(kW2, (in_memory_embed_size, hidden_size))
    W3 = _xavier_uniform(kW3, (hidden_size, 1))

    # Config 1: batch=2 (module-scale tiny shapes; padded to one 8-row tile).
    B = 2
    q1 = jax.random.normal(kq, (B, h_state_embed_size), jnp.float32)
    m1 = jax.random.normal(km, (B, S, in_memory_embed_size), jnp.float32)
    out1 = jax.block_until_ready(attention_forward(q1, m1, W, W2, W3))
    ref1 = _reference(q1, m1, W, W2, W3)
    assert out1.shape == ref1.shape == (B * S, 1), (out1.shape, ref1.shape)
    assert jnp.allclose(out1, ref1, atol=1e-4, rtol=1e-4)

    # Config 2: batch=16 -> two 8-row tiles; exercises the "parallel" grid.
    B = 16
    q2 = jax.random.normal(kq, (B, h_state_embed_size), jnp.float32)
    m2 = jax.random.normal(km, (B, S, in_memory_embed_size), jnp.float32)
    out2 = jax.block_until_ready(attention_forward(q2, m2, W, W2, W3))
    ref2 = _reference(q2, m2, W, W2, W3)
    assert out2.shape == ref2.shape == (B * S, 1), (out2.shape, ref2.shape)
    assert jnp.allclose(out2, ref2, atol=1e-4, rtol=1e-4)

    # Config 3: batch=20 (not a multiple of 8) -> wrapper pads and slices back.
    B = 20
    q3 = jax.random.normal(kq, (B, h_state_embed_size), jnp.float32)
    m3 = jax.random.normal(km, (B, S, in_memory_embed_size), jnp.float32)
    out3 = jax.block_until_ready(attention_forward(q3, m3, W, W2, W3))
    ref3 = _reference(q3, m3, W, W2, W3)
    assert out3.shape == ref3.shape == (B * S, 1), (out3.shape, ref3.shape)
    assert jnp.allclose(out3, ref3, atol=1e-4, rtol=1e-4)

    # Config 4: inputs stored bf16 upstream (no extra HBM cast pass); f32 accumulate.
    qb = q2.astype(jnp.bfloat16)
    mb = m2.astype(jnp.bfloat16)
    out4 = jax.block_until_ready(attention_forward(qb, mb, W, W2, W3, use_bf16=True))
    ref4 = _reference(qb.astype(jnp.float32), mb.astype(jnp.float32),
                      W.astype(jnp.bfloat16).astype(jnp.float32),
                      W2.astype(jnp.bfloat16).astype(jnp.float32), W3)
    assert out4.shape == (16 * S, 1), out4.shape
    assert jnp.allclose(out4, ref4, atol=1e-2, rtol=1e-2)

    print("KERNEL_OK")
</pallas_src>

<mosaic_0001>
module attributes {stable_mosaic.version = 11 : i64} {
  func.func @_attention_kernel(%arg0: i32, %arg1: memref<8x24xf32, #tpu.memory_space<vmem>>, %arg2: memref<8x128xf32, #tpu.memory_space<vmem>>, %arg3: memref<24x256xf32, #tpu.memory_space<vmem>>, %arg4: memref<128x256xf32, #tpu.memory_space<vmem>>, %arg5: memref<256x8xf32, #tpu.memory_space<vmem>>, %arg6: memref<8x8xf32, #tpu.memory_space<vmem>>) attributes {dimension_semantics = [#tpu.dimension_semantics<parallel>], iteration_bounds = array<i64: 1>, scalar_prefetch = 0 : i64, scratch_operands = 0 : i64, tpu.core_type = #tpu.core_type<tc>, window_params = [{transform_indices = @transform_0, window_bounds = array<i64: 8, 24>}, {transform_indices = @transform_1, window_bounds = array<i64: 8, 128>}, {pipeline_mode = #tpu.pipeline_mode<synchronous>, transform_indices = @transform_2, window_bounds = array<i64: 24, 256>}, {pipeline_mode = #tpu.pipeline_mode<synchronous>, transform_indices = @transform_3, window_bounds = array<i64: 128, 256>}, {pipeline_mode = #tpu.pipeline_mode<synchronous>, transform_indices = @transform_4, window_bounds = array<i64: 256, 8>}, {transform_indices = @transform_5, window_bounds = array<i64: 8, 8>}]} {
    %c0 = arith.constant 0 : index
    %c0_0 = arith.constant 0 : index
    %0 = vector.load %arg1[%c0, %c0_0] : memref<8x24xf32, #tpu.memory_space<vmem>>, vector<8x24xf32>
    %c0_1 = arith.constant 0 : index
    %c0_2 = arith.constant 0 : index
    %1 = vector.load %arg3[%c0_1, %c0_2] : memref<24x256xf32, #tpu.memory_space<vmem>>, vector<24x256xf32>
    %cst = arith.constant dense<0.000000e+00> : vector<8x256xf32>
    %2 = tpu.matmul %0, %1, %cst {dimension_numbers = #tpu.dot_dimension_numbers<[1], [0], [0], [1], [0, 0, 1, 1], [], []>} : vector<8x24xf32>, vector<24x256xf32>, vector<8x256xf32> -> vector<8x256xf32>
    %c0_3 = arith.constant 0 : index
    %c0_4 = arith.constant 0 : index
    %3 = vector.load %arg2[%c0_3, %c0_4] : memref<8x128xf32, #tpu.memory_space<vmem>>, vector<8x128xf32>
    %c0_5 = arith.constant 0 : index
    %c0_6 = arith.constant 0 : index
    %4 = vector.load %arg4[%c0_5, %c0_6] : memref<128x256xf32, #tpu.memory_space<vmem>>, vector<128x256xf32>
    %cst_7 = arith.constant dense<0.000000e+00> : vector<8x256xf32>
    %5 = tpu.matmul %3, %4, %cst_7 {dimension_numbers = #tpu.dot_dimension_numbers<[1], [0], [0], [1], [0, 0, 1, 1], [], []>} : vector<8x128xf32>, vector<128x256xf32>, vector<8x256xf32> -> vector<8x256xf32>
    %6 = arith.addf %5, %2 : vector<8x256xf32>
    %7 = math.tanh %6 : vector<8x256xf32>
    %c0_8 = arith.constant 0 : index
    %c0_9 = arith.constant 0 : index
    %8 = vector.load %arg5[%c0_8, %c0_9] : memref<256x8xf32, #tpu.memory_space<vmem>>, vector<256x8xf32>
    %cst_10 = arith.constant dense<0.000000e+00> : vector<8x8xf32>
    %9 = tpu.matmul %7, %8, %cst_10 {dimension_numbers = #tpu.dot_dimension_numbers<[1], [0], [0], [1], [0, 0, 1, 1], [], []>} : vector<8x256xf32>, vector<256x8xf32>, vector<8x8xf32> -> vector<8x8xf32>
    %c0_11 = arith.constant 0 : index
    %c0_12 = arith.constant 0 : index
    %10 = vector.load %arg6[%c0_11, %c0_12] : memref<8x8xf32, #tpu.memory_space<vmem>>, vector<8x8xf32>
    tpu.vector_store %arg6[%c0_11, %c0_12], %9 {strides = array<i32>} : memref<8x8xf32, #tpu.memory_space<vmem>>, vector<8x8xf32>,
    return
  }
  func.func @transform_0(%arg0: i32) -> (i32, i32) {
    %c0_i32 = arith.constant 0 : i32
    %c0_i32_0 = arith.constant 0 : i32
    return %arg0, %c0_i32 : i32, i32
  }
  func.func @transform_1(%arg0: i32) -> (i32, i32) {
    %c0_i32 = arith.constant 0 : i32
    %c0_i32_0 = arith.constant 0 : i32
    return %arg0, %c0_i32 : i32, i32
  }
  func.func @transform_2(%arg0: i32) -> (i32, i32) {
    %c0_i32 = arith.constant 0 : i32
    %c0_i32_0 = arith.constant 0 : i32
    %c0_i32_1 = arith.constant 0 : i32
    return %c0_i32, %c0_i32_0 : i32, i32
  }
  func.func @transform_3(%arg0: i32) -> (i32, i32) {
    %c0_i32 = arith.constant 0 : i32
    %c0_i32_0 = arith.constant 0 : i32
    %c0_i32_1 = arith.constant 0 : i32
    return %c0_i32, %c0_i32_0 : i32, i32
  }
  func.func @transform_4(%arg0: i32) -> (i32, i32) {
    %c0_i32 = arith.constant 0 : i32
    %c0_i32_0 = arith.constant 0 : i32
    %c0_i32_1 = arith.constant 0 : i32
    return %c0_i32, %c0_i32_0 : i32, i32
  }
  func.func @transform_5(%arg0: i32) -> (i32, i32) {
    %c0_i32 = arith.constant 0 : i32
    %c0_i32_0 = arith.constant 0 : i32
    return %arg0, %c0_i32 : i32, i32
  }
}

</mosaic_0001>

<bundles_post_ra>
// kernel: tpu_custom_call.1
= control target key start
LH: loop header
LB: loop body
LE: loop exit
PB: predicated region body
PF: predicated region fallthrough
CT: control target
= control target key end

     0   :  { %10 = vsyncpa [#allocation3], 0  ;;  %s762_s0 = inlined_call_operand.vmem [shape: f32[8,24], index: 0, kind: input, shape index: {}]   ;;  %s763_s1 = inlined_call_operand.vmem [shape: f32[8,128], index: 1, kind: input, shape index: {}]   ;;  %s764_s2 = inlined_call_operand.hbm [shape: f32[24,256], index: 2, kind: input, shape index: {}]   ;;  %s765_s3 = inlined_call_operand.vmem [shape: f32[128,256], index: 3, kind: input, shape index: {}]   ;;  %s766_s4 = inlined_call_operand.vmem [shape: f32[256,8], index: 4, kind: input, shape index: {}]   ;;  %s767_s5 = inlined_call_operand.hbm [shape: f32[8,8], index: 5, kind: output, shape index: {}]  }
   0x1   :  { %11 = vsyncpa [#allocation4], 0  ;;  %s505_s18 = smov [#allocation2]   ;;  %s457_s22 = scalar_lea.hbm %s764_s2, 768 }
   0x2   :  { %s21_s19 = sshll.u32 %s505_s18, 4  ;;  %p458_p0 = scmp.ne.s32.totalorder %s764_s2, %s457_s22  ;;  %s22_s19 = int_to_ptr.vmem [resolvable:$true] %s21_s19 }
   0x3   :  { %p461_p1 = scmp.lt.u32.totalorder %s457_s22, %s764_s2 }
   0x5   :  { %p463_p2 = pnand %p461_p1, %p458_p0 }
   0x7   :  { %466 = shalt.err (!%p463_p2)
}
   0x8   :  { %s467_s27 = scalar_lea.vmem %s22_s19, 768  ;;  %p472_p4 = scmp.lt.s32.totalorder %s22_s19, %s22_s19 }
   0x9   :  { %p468_p3 = scmp.ne.s32.totalorder %s22_s19, %s467_s27  ;;  %p473_p5 = scmp.lt.s32.totalorder %s467_s27, %s467_s27 }
   0xb   :  { %p474_p6 = por %p473_p5, %p472_p4 }
   0xd   :  { %p475_p7 = pnand %p474_p6, %p468_p3 }
   0xf   :  { %478 = shalt.err (!%p475_p7)
}
  0x10   :  { %s506_s28 = smov 256   ;;  %s507_s29 = smov 16  }
  0x11   :  { %27 = dma.hbm_to_vmem [thread:$0]  %s764_s2, 768, %s22_s19, [#allocation3], %s506_s28, %s506_s28, %s507_s29  }
  0x12   :  { %501 = dma.done.wait [#allocation3], 768  }
  0x13   :  { %502 = vsyncadd [#allocation3], 4294966528  ;;  %v508_v0 = vmov 0.0   ;;  %v37_v1 = vld [vmem:[#allocation2 + $0x8] sm:$0xff]  ;;  %v39_v2 = vld [vmem:[#allocation2 + $0x18] sm:$0xff]  ;;  %vm42_vm0 = vcmask 195584  }
  0x14   :  { %110 = vmatprep.mubr.f32.mxu0 %v508_v0  ;;  %v36_v3 = vld [vmem:[#allocation2] sm:$0xff]  ;;  %v378_v4 = vpack.c.bf16 %v39_v2, %v37_v1  ;;  %v38_v5 = vld [vmem:[#allocation2 + $0x10] sm:$0xff]  ;;  %v41_v7 = vld [vmem:[#allocation2 + $0x28] sm:$0xff]  ;;  %vm325_vm1 = vcmask 64512  }
  0x15   :  { %v380_v6 = vpack.c.bf16 %v38_v5, %v36_v3  ;;  %v119_v8 = vld [vmem:[%s765_s3 + $0x8] sm:$0xff]  ;;  %v121_v9 = vld [vmem:[%s765_s3 + $0x18] sm:$0xff]  ;;  %v118_v10 = vld [vmem:[%s765_s3] sm:$0xff] }
  0x16   :  { %379 = vmatprep.subr.bf16.mxu0 %v378_v4  ;;  %v120_v11 = vld [vmem:[%s765_s3 + $0x10] sm:$0xff]  ;;  %v123_v12 = vld [vmem:[%s765_s3 + $0x28] sm:$0xff]  ;;  %v125_v13 = vld [vmem:[%s765_s3 + $0x38] sm:$0xff]  ;;  %v382_v15 = vpack.c.bf16 %v121_v9, %v119_v8 }
  0x17   :  { %381 = vmatpush1.bf16.msra.mxu0 %v380_v6  ;;  %v40_v14 = vld [vmem:[#allocation2 + $0x20] sm:$0xff]  ;;  %v384_v17 = vpack.c.bf16 %v120_v11, %v118_v10  ;;  %v386_v18 = vpack.c.bf16 %v125_v13, %v123_v12  ;;  %v124_v20 = vld [vmem:[%s765_s3 + $0x30] sm:$0xff]  ;;  %v127_v21 = vld [vmem:[%s765_s3 + $0x48] sm:$0xff] }
  0x18   :  { %50 = vmatprep.subr.mxu0 %v41_v7  ;;  %v35_v16 = vld [vmem:[%s762_s0] sm:$0xff]  ;;  %v129_v22 = vld [vmem:[%s765_s3 + $0x58] sm:$0xff]  ;;  %v128_v26 = vld [vmem:[%s765_s3 + $0x50] sm:$0xff]  ;;  %s509_s0 = smov [#allocation5]  }
  0x19   :  { %v122_v19 = vld [vmem:[%s765_s3 + $0x20] sm:$0xff]  ;;  %v390_v24 = vpack.c.bf16 %v129_v22, %v127_v21  ;;  %v131_v27 = vld [vmem:[%s765_s3 + $0x68] sm:$0xff]  ;;  %v133_v28 = vld [vmem:[%s765_s3 + $0x78] sm:$0xff]  ;;  %s333_s28 = sshll.u32 %s509_s0, 4  ;;  %s334_s28 = int_to_ptr.vmem [resolvable:$true] %s333_s28 }
  0x1a   :  { %v388_v23 = vpack.c.bf16 %v124_v20, %v122_v19  ;;  %v126_v25 = vld [vmem:[%s765_s3 + $0x40] sm:$0xff]  ;;  %v132_v30 = vld [vmem:[%s765_s3 + $0x70] sm:$0xff]  ;;  %v240_v32 = vld [vmem:[%s766_s4 + $0x88] sm:$0xff]  ;;  %v394_v39 = vpack.c.bf16 %v133_v28, %v131_v27  ;;  %p484_p9 = scmp.lt.s32.totalorder %s334_s28, %s334_s28 }
  0x1b   :  { %51 = vmatpush1.msra.mxu0 %v40_v14  ;;  %v130_v29 = vld [vmem:[%s765_s3 + $0x60] sm:$0xff]  ;;  %v392_v33 = vpack.c.bf16 %v128_v26, %v126_v25  ;;  %v135_v34 = vld [vmem:[%s765_s3 + $0x88] sm:$0xff]  ;;  %v241_v38 = vld [vmem:[%s766_s4 + $0x90] sm:$0xff] }
  0x1c   :  { %383 = vmatprep.subr.bf16.mxu0 %v382_v15  ;;  %342 = vmatmul.mubr.msk.f32.vlgmr.msra.gmra.mrb[0].mxu0 %vm42_vm0, %v35_v16  ;;  %v239_v31 = vld [vmem:[%s766_s4 + $0x80] sm:$0xff]  ;;  %v224_v37 = vld [vmem:[%s766_s4 + $0x8] sm:$0xff]  ;;  %v242_v41 = vld [vmem:[%s766_s4 + $0x98] sm:$0xff]  ;;  %v396_v49 = vpack.c.bf16 %v132_v30, %v130_v29 }
  0x1d   :  { %385 = vmatpush1.bf16.msra.mxu0 %v384_v17  ;;  %214 = vmatprep.mubr.f32.mxu0 %v508_v0  ;;  %v414_v35 = vpack.c.bf16 %v240_v32, %v239_v31  ;;  %v223_v36 = vld [vmem:[%s766_s4] sm:$0xff]  ;;  %v225_v42 = vld [vmem:[%s766_s4 + $0x10] sm:$0xff]  ;;  %v226_v43 = vld [vmem:[%s766_s4 + $0x18] sm:$0xff]  ;;  %v418_v45 = vpack.c.bf16 %v242_v41, %v241_v38 }
  0x1e   :  { %387 = vmatprep.subr.bf16.mxu0 %v386_v18  ;;  %v416_v40 = vpack.c.bf16 %v224_v37, %v223_v36  ;;  %v137_v44 = vld [vmem:[%s765_s3 + $0x98] sm:$0xff]  ;;  %v243_v46 = vld [vmem:[%s766_s4 + $0xa0] sm:$0xff]  ;;  %v244_v47 = vld [vmem:[%s766_s4 + $0xa8] sm:$0xff]  ;;  %v420_v48 = vpack.c.bf16 %v226_v43, %v225_v42 }
  0x1f   :  { %415 = vmatprep.subr.bf16.mxu1 %v414_v35  ;;  %v134_v50 = vld [vmem:[%s765_s3 + $0x80] sm:$0xff]  ;;  %v422_v51 = vpack.c.bf16 %v244_v47, %v243_v46  ;;  %v228_v53 = vld [vmem:[%s766_s4 + $0x28] sm:$0xff]  ;;  %v398_v54 = vpack.c.bf16 %v137_v44, %v135_v34  ;;  %v136_v55 = vld [vmem:[%s765_s3 + $0x90] sm:$0xff] }
  0x20   :  { %417 = vmatpush3.bf16.msra.mxu1 %v416_v40  ;;  %v227_v52 = vld [vmem:[%s766_s4 + $0x20] sm:$0xff]  ;;  %v245_v56 = vld [vmem:[%s766_s4 + $0xb0] sm:$0xff]  ;;  %v246_v57 = vld [vmem:[%s766_s4 + $0xb8] sm:$0xff]  ;;  %v400_v61 = vpack.c.bf16 %v136_v55, %v134_v50 }
  0x21   :  { %389 = vmatpush1.bf16.msra.mxu0 %v388_v23  ;;  %419 = vmatprep.subr.bf16.mxu1 %v418_v45  ;;  %v139_v58 = vld [vmem:[%s765_s3 + $0xa8] sm:$0xff]  ;;  %v141_v59 = vld [vmem:[%s765_s3 + $0xb8] sm:$0xff]  ;;  %v424_v60 = vpack.c.bf16 %v228_v53, %v227_v52  ;;  %v138_v62 = vld [vmem:[%s765_s3 + $0xa0] sm:$0xff]  ;;  %v426_v63 = vpack.c.bf16 %v246_v57, %v245_v56 }
  0x22   :  { %391 = vmatprep.subr.bf16.mxu0 %v390_v24  ;;  %v229_v0 = vld [vmem:[%s766_s4 + $0x30] sm:$0xff]  ;;  %v230_v1 = vld [vmem:[%s766_s4 + $0x38] sm:$0xff]  ;;  %v402_v2 = vpack.c.bf16 %v141_v59, %v139_v58  ;;  %v247_v4 = vld [vmem:[%s766_s4 + $0xc0] sm:$0xff] }
  0x23   :  { %v140_v3 = vld [vmem:[%s765_s3 + $0xb0] sm:$0xff]  ;;  %v248_v5 = vld [vmem:[%s766_s4 + $0xc8] sm:$0xff]  ;;  %v145_v7 = vld [vmem:[%s765_s3 + $0xd8] sm:$0xff]  ;;  %v428_v8 = vpack.c.bf16 %v230_v1, %v229_v0 }
  0x24   :  { %421 = vmatpush3.bf16.msra.mxu1 %v420_v48  ;;  %v143_v6 = vld [vmem:[%s765_s3 + $0xc8] sm:$0xff]  ;;  %v404_v9 = vpack.c.bf16 %v140_v3, %v138_v62  ;;  %v430_v10 = vpack.c.bf16 %v248_v5, %v247_v4  ;;  %v231_v11 = vld [vmem:[%s766_s4 + $0x40] sm:$0xff]  ;;  %v144_v15 = vld [vmem:[%s765_s3 + $0xd0] sm:$0xff] }
  0x25   :  { %393 = vmatpush1.bf16.msra.mxu0 %v392_v33  ;;  %423 = vmatprep.subr.bf16.mxu1 %v422_v51  ;;  %v232_v12 = vld [vmem:[%s766_s4 + $0x48] sm:$0xff]  ;;  %v406_v13 = vpack.c.bf16 %v145_v7, %v143_v6  ;;  %v142_v14 = vld [vmem:[%s765_s3 + $0xc0] sm:$0xff]  ;;  %v149_v17 = vld [vmem:[%s765_s3 + $0xf8] sm:$0xff] }
  0x26   :  { %395 = vmatprep.subr.bf16.mxu0 %v394_v39  ;;  %v147_v16 = vld [vmem:[%s765_s3 + $0xe8] sm:$0xff]  ;;  %v432_v18 = vpack.c.bf16 %v232_v12, %v231_v11  ;;  %v408_v19 = vpack.c.bf16 %v144_v15, %v142_v14  ;;  %v146_v21 = vld [vmem:[%s765_s3 + $0xe0] sm:$0xff]  ;;  %v148_v22 = vld [vmem:[%s765_s3 + $0xf0] sm:$0xff] }
  0x27   :  { %v410_v20 = vpack.c.bf16 %v149_v17, %v147_v16  ;;  %v412_v23 = vpack.c.bf16 %v148_v22, %v146_v21  ;;  %v117_v24 = vld [vmem:[%s763_s1] sm:$0xff]  ;;  %v249_v25 = vld [vmem:[%s766_s4 + $0xd0] sm:$0xff]  ;;  %v250_v26 = vld [vmem:[%s766_s4 + $0xd8] sm:$0xff] }
  0x28   :  { %425 = vmatpush3.bf16.msra.mxu1 %v424_v60  ;;  %v434_v27 = vpack.c.bf16 %v250_v26, %v249_v25  ;;  %v233_v28 = vld [vmem:[%s766_s4 + $0x50] sm:$0xff]  ;;  %v234_v29 = vld [vmem:[%s766_s4 + $0x58] sm:$0xff]  ;;  %v251_v31 = vld [vmem:[%s766_s4 + $0xe0] sm:$0xff] }
  0x29   :  { %397 = vmatpush1.bf16.msra.mxu0 %v396_v49  ;;  %427 = vmatprep.subr.bf16.mxu1 %v426_v63  ;;  %v436_v30 = vpack.c.bf16 %v234_v29, %v233_v28  ;;  %v252_v32 = vld [vmem:[%s766_s4 + $0xe8] sm:$0xff]  ;;  %v235_v33 = vld [vmem:[%s766_s4 + $0x60] sm:$0xff]  ;;  %v253_v36 = vld [vmem:[%s766_s4 + $0xf0] sm:$0xff] }
  0x2a   :  { %399 = vmatprep.subr.bf16.mxu0 %v398_v54  ;;  %v438_v34 = vpack.c.bf16 %v252_v32, %v251_v31  ;;  %v236_v35 = vld [vmem:[%s766_s4 + $0x68] sm:$0xff]  ;;  %v254_v37 = vld [vmem:[%s766_s4 + $0xf8] sm:$0xff]  ;;  %v237_v40 = vld [vmem:[%s766_s4 + $0x70] sm:$0xff] }
  0x2b   :  { %v440_v38 = vpack.c.bf16 %v236_v35, %v235_v33  ;;  %v442_v39 = vpack.c.bf16 %v254_v37, %v253_v36  ;;  %v238_v41 = vld [vmem:[%s766_s4 + $0x78] sm:$0xff]  ;;  %s479_s4 = scalar_lea.vmem %s334_s28, 128 }
  0x2c   :  { %429 = vmatpush3.bf16.msra.mxu1 %v428_v8  ;;  %v444_v42 = vpack.c.bf16 %v238_v41, %v237_v40  ;;  %p480_p8 = scmp.ne.s32.totalorder %s334_s28, %s479_s4  ;;  %p485_p10 = scmp.lt.s32.totalorder %s479_s4, %s479_s4 }
  0x2d   :  { %401 = vmatpush1.bf16.msra.mxu0 %v400_v61  ;;  %431 = vmatprep.subr.bf16.mxu1 %v430_v10 }
  0x2e   :  { %403 = vmatprep.subr.bf16.mxu0 %v402_v2  ;;  %p486_p11 = por %p485_p10, %p484_p9 }
  0x30   :  { %433 = vmatpush3.bf16.msra.mxu1 %v432_v18  ;;  %p487_p12 = pnand %p486_p11, %p480_p8 }
  0x31   :  { %405 = vmatpush1.bf16.msra.mxu0 %v404_v9  ;;  %435 = vmatprep.subr.bf16.mxu1 %v434_v27 }
  0x32   :  { %407 = vmatprep.subr.bf16.mxu0 %v406_v13 }
  0x34   :  { %437 = vmatpush3.bf16.msra.mxu1 %v436_v30 }
  0x35   :  { %409 = vmatpush1.bf16.msra.mxu0 %v408_v19  ;;  %439 = vmatprep.subr.bf16.mxu1 %v438_v34 }
  0x36   :  { %411 = vmatprep.subr.bf16.mxu0 %v410_v20 }
  0x38   :  { %441 = vmatpush3.bf16.msra.mxu1 %v440_v38 }
  0x39   :  { %413 = vmatpush1.bf16.msra.mxu0 %v412_v23  ;;  %443 = vmatprep.subr.bf16.mxu1 %v442_v39 }
  0x3c   :  { %215 = vmatmul.mubr.f32.vlgmr.msra.gmra.mrb[0].mxu0 %v117_v24  ;;  %445 = vmatpush3.bf16.msra.mxu1 %v444_v42 }
 0x10f   :  { %v216_v43 = vpop.f32.mrb[0].mxu0 }
 0x110   :  { %v218_v44 = vpop.f32.mrb[1].mxu0 }
 0x111   :  { %453 = vtanh.f32 %v218_v44 }
 0x112   :  { %455 = vtanh.f32 %v216_v43 }
 0x11b   :  { %v454_v45 = vpop.eup %453 }
 0x11c   :  { %v456_v46 = vpop.eup %455  ;;  %319 = vmatprep.mubr.f32.mxu1 %v454_v45 }
 0x11d   :  { %320 = vmatmul.mubr.f32.vlgmr.msra.gmra.mrb[0].mxu1 %v456_v46 }
 0x1f0   :  { %v375_v47 = vpop.f32.mrb[0].mxu1 }
 0x1f1   :  { %v376_v48 = vpop.f32.mrb[1].mxu1 }
 0x1f2   :  { %v377_v49 = vadd.f32 %v376_v48, %v375_v47 }
 0x1f4   :  { %326 = vst.msk [vmem:[#allocation5] sm:$0xff] %vm325_vm1, %v377_v49 }
 0x1f5   :  { %490 = shalt.err (!%p487_p12)
}
 0x1f6   :  { %s491_s6 = scalar_lea.hbm %s767_s5, 128 }
 0x1f7   :  { %p492_p13 = scmp.ne.s32.totalorder %s767_s5, %s491_s6  ;;  %p495_p0 = scmp.lt.u32.totalorder %s491_s6, %s767_s5 }
 0x1f9   :  { %p497_p1 = pnand %p495_p0, %p492_p13 }
 0x1fb   :  { %500 = shalt.err (!%p497_p1)
}
 0x1fc   :  { %336 = dma.vmem_to_hbm [thread:$0]  %s334_s28, 128, %s767_s5, [#allocation4]  }
 0x1fd   :  { %503 = dma.done.wait [#allocation4], 128  }
 0x1fe   :  { %504 = vsyncadd [#allocation4], 4294967168 }
 0x1ff   :  { %340 = vsyncpa [#allocation3], 1 }
 0x200   :  { %341 = vsyncpa [#allocation4], 1 }

</bundles_post_ra>
